<compile_context>
chip_gen: v6e
topology: v6e:2x2x1
jax: 0.10.0
libtpu: 0.0.40
codegen_flags: <defaults>
</compile_context>

<pallas_src>
import jax
import jax.numpy as jnp
from jax import lax
from jax.experimental import pallas as pl
from jax.experimental.pallas import tpu as pltpu


def _round_up(x: int, m: int) -> int:
    return ((x + m - 1) // m) * m


def _make_kernel(tile_n: int, vocab: int):
    def kernel(tok_ref, bin_ref, emb_ref, w_ref, b_ref, out_ref):
        # tok_ref : (tile_n, 1)  int32  VMEM  clamped token ids for this tile
        # bin_ref : (tile_n, F)  f32    VMEM  binary-feature tile
        # emb_ref : (V, D)       f32    VMEM  embedding table (resident)
        # w_ref   : (F, D)       f32    VMEM  linear weight  (resident)
        # b_ref   : (1, D)       f32    VMEM  linear bias    (resident)
        # out_ref : (tile_n, D)  f32    VMEM  output tile
        ids = tok_ref[...]                                              # (tile_n, 1)
        cols = lax.broadcasted_iota(jnp.int32, (tile_n, vocab), 1)      # (tile_n, V)
        onehot = (ids == cols).astype(jnp.float32)                      # exact 0/1

        # On-chip gather: one-hot selection through the MXU (exact at HIGHEST).
        base = jnp.dot(
            onehot, emb_ref[...],
            preferred_element_type=jnp.float32,
            precision=lax.Precision.HIGHEST,
        )
        # Linear projection of the binary features.
        proj = jnp.dot(
            bin_ref[...], w_ref[...],
            preferred_element_type=jnp.float32,
            precision=lax.Precision.HIGHEST,
        )
        # Single fused output write (bias folded in).
        out_ref[...] = (base + proj + b_ref[...]).astype(out_ref.dtype)

    return kernel


def binary_aware_embedding(tokens, binary, emb_table, w, b, *, tile_n=512):
    """tokens: (B, S) int; binary: (B, S, F) f32; emb_table: (V, D) f32;
    w: (F, D) (= torch Linear weight transposed); b: (D,).  Returns (B, S, D) f32."""
    B, S = tokens.shape
    F = binary.shape[-1]
    V, D = emb_table.shape
    N = B * S

    table_bytes = V * D * 4
    if table_bytes > 24 * 1024 * 1024:
        # TODO(synk): HBM DMA-gather fallback for very large vocabularies.
        raise NotImplementedError(
            "embedding table too large for the VMEM-resident gather path")

    # Row tile: multiple of 8 sublanes, clamped to the padded problem size,
    # then halved until the grid has >= 2 steps (keeps both v7x TCs busy).
    tile_n = max(8, (min(tile_n, _round_up(N, 8)) // 8) * 8)
    while tile_n > 8 and _round_up(N, tile_n) // tile_n < 2:
        tile_n = max(8, _round_up(tile_n // 2, 8))
    n_pad = _round_up(N, tile_n)
    grid = (n_pad // tile_n,)

    # Clamp in the wrapper: upper clamp matches torch's clamp(max=V-1); lower
    # clamp keeps invalid negative ids from selecting nothing in the one-hot.
    tok_flat = jnp.clip(tokens.reshape(N, 1).astype(jnp.int32), 0, V - 1)
    bin_flat = binary.reshape(N, F).astype(jnp.float32)
    if n_pad != N:  # skip the extra HBM copy in the exactly-tiled common case
        tok_flat = jnp.pad(tok_flat, ((0, n_pad - N), (0, 0)))
        bin_flat = jnp.pad(bin_flat, ((0, n_pad - N), (0, 0)))
    b2d = b.reshape(1, D).astype(jnp.float32)

    # Rough VMEM budget (resident table/W/b + double-buffered tiles); only
    # raise the scoped limit when it is actually needed (v5e default is 16 MiB).
    vmem_need = (
        2 * table_bytes
        + 2 * (F * D * 4 + D * 4)
        + 2 * (tile_n * F * 4 + tile_n * 4 + tile_n * D * 4)
    )
    cp_kwargs = dict(dimension_semantics=("parallel",))
    if vmem_need > 12 * 1024 * 1024:
        cp_kwargs["vmem_limit_bytes"] = min(vmem_need * 2, 60 * 1024 * 1024)

    cost = pl.CostEstimate(
        flops=2 * n_pad * D * (V + F),
        transcendentals=0,
        bytes_accessed=4 * (n_pad * (1 + F + D) + V * D + F * D + D),
    )

    out_flat = pl.pallas_call(
        _make_kernel(tile_n, V),
        out_shape=jax.ShapeDtypeStruct((n_pad, D), jnp.float32),
        grid_spec=pltpu.PrefetchScalarGridSpec(
            num_scalar_prefetch=0,
            grid=grid,
            in_specs=[
                pl.BlockSpec((tile_n, 1), lambda i: (i, 0)),   # token ids tile
                pl.BlockSpec((tile_n, F), lambda i: (i, 0)),   # binary tile
                pl.BlockSpec((V, D), lambda i: (0, 0)),        # table, resident
                pl.BlockSpec((F, D), lambda i: (0, 0)),        # weight, resident
                pl.BlockSpec((1, D), lambda i: (0, 0)),        # bias, resident
            ],
            out_specs=pl.BlockSpec((tile_n, D), lambda i: (i, 0)),
        ),
        compiler_params=pltpu.CompilerParams(**cp_kwargs),
        cost_estimate=cost,
    )(tok_flat, bin_flat, emb_table.astype(jnp.float32), w.astype(jnp.float32), b2d)

    return out_flat[:N].reshape(B, S, D)


if __name__ == "__main__":
    # Small, deterministic configuration (matches the nn.Module defaults).
    vocab_size = 64
    embed_dim = 128
    binary_dim = 32
    F = binary_dim + 1
    B, S = 2, 8

    key = jax.random.PRNGKey(0)
    k_emb, k_w, k_b, k_tok, k_bin = jax.random.split(key, 5)

    emb_table = jax.random.normal(k_emb, (vocab_size, embed_dim), jnp.float32)
    bound = 1.0 / jnp.sqrt(F)
    w = jax.random.uniform(k_w, (F, embed_dim), jnp.float32, -bound, bound)  # (in, out)
    b = jax.random.uniform(k_b, (embed_dim,), jnp.float32, -bound, bound)

    # Include tokens >= vocab_size to exercise the clamp (non-negative, as torch requires).
    tokens = jax.random.randint(k_tok, (B, S), 0, vocab_size + 10, dtype=jnp.int32)
    binary = jax.random.normal(k_bin, (B, S, F), jnp.float32)

    out = jax.block_until_ready(binary_aware_embedding(tokens, binary, emb_table, w, b))

    # Pure-JAX reference (same f32 precision as the kernel).
    tok_c = jnp.minimum(tokens, vocab_size - 1)
    ref = emb_table[tok_c] + (
        jnp.dot(binary, w, precision=jax.lax.Precision.HIGHEST) + b
    )
    assert out.shape == (B, S, embed_dim)
    assert jnp.allclose(out, ref, atol=1e-3, rtol=1e-3), float(
        jnp.max(jnp.abs(out - ref))
    )

    print("KERNEL_OK")
</pallas_src>

<mosaic_0001>
module attributes {stable_mosaic.version = 11 : i64} {
  func.func @kernel(%arg0: i32, %arg1: memref<8x1xi32, #tpu.memory_space<vmem>>, %arg2: memref<8x33xf32, #tpu.memory_space<vmem>>, %arg3: memref<64x128xf32, #tpu.memory_space<vmem>>, %arg4: memref<33x128xf32, #tpu.memory_space<vmem>>, %arg5: memref<1x128xf32, #tpu.memory_space<vmem>>, %arg6: memref<8x128xf32, #tpu.memory_space<vmem>>) attributes {dimension_semantics = [#tpu.dimension_semantics<parallel>], iteration_bounds = array<i64: 2>, scalar_prefetch = 0 : i64, scratch_operands = 0 : i64, tpu.core_type = #tpu.core_type<tc>, window_params = [{transform_indices = @transform_0, window_bounds = array<i64: 8, 1>}, {transform_indices = @transform_1, window_bounds = array<i64: 8, 33>}, {pipeline_mode = #tpu.pipeline_mode<synchronous>, transform_indices = @transform_2, window_bounds = array<i64: 64, 128>}, {pipeline_mode = #tpu.pipeline_mode<synchronous>, transform_indices = @transform_3, window_bounds = array<i64: 33, 128>}, {pipeline_mode = #tpu.pipeline_mode<synchronous>, transform_indices = @transform_4, window_bounds = array<i64: 1, 128>}, {transform_indices = @transform_5, window_bounds = array<i64: 8, 128>}]} {
    %c0 = arith.constant 0 : index
    %c0_0 = arith.constant 0 : index
    %0 = vector.load %arg1[%c0, %c0_0] : memref<8x1xi32, #tpu.memory_space<vmem>>, vector<8x1xi32>
    %1 = tpu.iota {dimensions = array<i32: 1>} : vector<8x64xi32>
    %2 = vector.broadcast %0 : vector<8x1xi32> to vector<8x64xi32>
    %3 = arith.cmpi eq, %2, %1 : vector<8x64xi32>
    %4 = arith.extui %3 : vector<8x64xi1> to vector<8x64xi32>
    %5 = arith.sitofp %4 : vector<8x64xi32> to vector<8x64xf32>
    %c0_1 = arith.constant 0 : index
    %c0_2 = arith.constant 0 : index
    %6 = vector.load %arg3[%c0_1, %c0_2] : memref<64x128xf32, #tpu.memory_space<vmem>>, vector<64x128xf32>
    %cst = arith.constant dense<0.000000e+00> : vector<8x128xf32>
    %7 = tpu.matmul %5, %6, %cst {dimension_numbers = #tpu.dot_dimension_numbers<[1], [0], [0], [1], [0, 0, 1, 1], [], []>, precision = #tpu.contract_precision<fp32>} : vector<8x64xf32>, vector<64x128xf32>, vector<8x128xf32> -> vector<8x128xf32>
    %c0_3 = arith.constant 0 : index
    %c0_4 = arith.constant 0 : index
    %8 = vector.load %arg2[%c0_3, %c0_4] : memref<8x33xf32, #tpu.memory_space<vmem>>, vector<8x33xf32>
    %c0_5 = arith.constant 0 : index
    %c0_6 = arith.constant 0 : index
    %9 = vector.load %arg4[%c0_5, %c0_6] : memref<33x128xf32, #tpu.memory_space<vmem>>, vector<33x128xf32>
    %cst_7 = arith.constant dense<0.000000e+00> : vector<8x128xf32>
    %10 = tpu.matmul %8, %9, %cst_7 {dimension_numbers = #tpu.dot_dimension_numbers<[1], [0], [0], [1], [0, 0, 1, 1], [], []>, precision = #tpu.contract_precision<fp32>} : vector<8x33xf32>, vector<33x128xf32>, vector<8x128xf32> -> vector<8x128xf32>
    %11 = arith.addf %7, %10 : vector<8x128xf32>
    %c0_8 = arith.constant 0 : index
    %c0_9 = arith.constant 0 : index
    %12 = vector.load %arg5[%c0_8, %c0_9] : memref<1x128xf32, #tpu.memory_space<vmem>>, vector<1x128xf32>
    %13 = vector.broadcast %12 : vector<1x128xf32> to vector<8x128xf32>
    %14 = arith.addf %11, %13 : vector<8x128xf32>
    %c0_10 = arith.constant 0 : index
    %c0_11 = arith.constant 0 : index
    %15 = vector.load %arg6[%c0_10, %c0_11] : memref<8x128xf32, #tpu.memory_space<vmem>>, vector<8x128xf32>
    tpu.vector_store %arg6[%c0_10, %c0_11], %14 {strides = array<i32>} : memref<8x128xf32, #tpu.memory_space<vmem>>, vector<8x128xf32>,
    return
  }
  func.func @transform_0(%arg0: i32) -> (i32, i32) {
    %c0_i32 = arith.constant 0 : i32
    %c0_i32_0 = arith.constant 0 : i32
    return %arg0, %c0_i32 : i32, i32
  }
  func.func @transform_1(%arg0: i32) -> (i32, i32) {
    %c0_i32 = arith.constant 0 : i32
    %c0_i32_0 = arith.constant 0 : i32
    return %arg0, %c0_i32 : i32, i32
  }
  func.func @transform_2(%arg0: i32) -> (i32, i32) {
    %c0_i32 = arith.constant 0 : i32
    %c0_i32_0 = arith.constant 0 : i32
    %c0_i32_1 = arith.constant 0 : i32
    return %c0_i32, %c0_i32_0 : i32, i32
  }
  func.func @transform_3(%arg0: i32) -> (i32, i32) {
    %c0_i32 = arith.constant 0 : i32
    %c0_i32_0 = arith.constant 0 : i32
    %c0_i32_1 = arith.constant 0 : i32
    return %c0_i32, %c0_i32_0 : i32, i32
  }
  func.func @transform_4(%arg0: i32) -> (i32, i32) {
    %c0_i32 = arith.constant 0 : i32
    %c0_i32_0 = arith.constant 0 : i32
    %c0_i32_1 = arith.constant 0 : i32
    return %c0_i32, %c0_i32_0 : i32, i32
  }
  func.func @transform_5(%arg0: i32) -> (i32, i32) {
    %c0_i32 = arith.constant 0 : i32
    %c0_i32_0 = arith.constant 0 : i32
    return %arg0, %c0_i32 : i32, i32
  }
}

</mosaic_0001>

<bundles_post_ra>
// kernel: tpu_custom_call.1
= control target key start
LH: loop header
LB: loop body
LE: loop exit
PB: predicated region body
PF: predicated region fallthrough
CT: control target
= control target key end

     0   :  { %10 = vsyncpa [#allocation3], 0  ;;  %s2438_s0 = inlined_call_operand.vmem [shape: s32[16,1], index: 0, kind: input, shape index: {}]   ;;  %s2439_s1 = inlined_call_operand.vmem [shape: f32[16,33], index: 1, kind: input, shape index: {}]   ;;  %s2440_s2 = inlined_call_operand.hbm [shape: f32[64,128], index: 2, kind: input, shape index: {}]   ;;  %s2441_s3 = inlined_call_operand.hbm [shape: f32[33,128], index: 3, kind: input, shape index: {}]   ;;  %s2442_s4 = inlined_call_operand.vmem [shape: f32[1,128], index: 4, kind: input, shape index: {}]   ;;  %s2443_s5 = inlined_call_operand.hbm [shape: f32[16,128], index: 5, kind: output, shape index: {}]  }
   0x1   :  { %11 = vsyncpa [#allocation6], 0 }
   0x2   :  { %12 = vsyncpa [#allocation4], 0 }
   0x3   :  { %14 = vsyncpa [#allocation4 + $0x1], 0  ;;  %s1981_s18 = smov 0   ;;  %s1983_s19 = smov 0  }
   0x4   :  { %s1985_s20 = smov 0   ;;  %s1987_s21 = smov 0  }
   0x5 LB: > { %s2002_s22 = sadd.s32 4294967295, %s1941_s21   ;;  %s1453_s23 = sadd.s32 4294967294, %s1941_s21   ;;  %s1941_s21 = sphi %s1987_s21, %s2457_s21   ;;  %s1937_s20 = sphi %s1985_s20, %s2456_s20   ;;  %s1933_s19 = sphi %s1983_s19, %s2455_s19   ;;  %s1929_s18 = sphi %s1981_s18, %s2454_s18  }
   0x6   : > { %s2006_s24 = sadd.s32 1, %s1941_s21   ;;  %s142_s25 = sadd.s32 1, %s1937_s20 }
   0x7   : > { %s139_s26 = ssub.s32 %s1941_s21, %s2006_s24  ;;  %p152_p0 = scmp.ne.s32.totalorder %s1937_s20, %s1933_s19 }
   0x8   : > { %p140_p1 = scmp.eq.s32.totalorder %s139_s26, 0  ;;  %p153_p2 = scmp.eq.s32.totalorder %s2002_s22, 1 }
   0x9   : > { %p158_p3 = scmp.ne.s32.totalorder %s1933_s19, %s1929_s18  ;;  %p159_p4 = scmp.eq.s32.totalorder %s1453_s23, 1 }
   0xa   : > { %s2017_s27 = scalar_select %p140_p1, %s1937_s20, %s142_s25  }
   0xb   : > { %p2019_p5 = por %p153_p2, %p152_p0  ;;  %p2023_p6 = por %p159_p4, %p158_p3 }
   0xc   : > { %p1454_p7 = scmp.ge.s32.totalorder %s1941_s21, 1  ;;  %p166_p8 = scmp.lt.s32.totalorder %s1941_s21, 3 }
   0xd   : > { %s2446_s29 = scalar_select %p2023_p6, 1, 0 }
   0xe   : > { %p2444_p9 = scmp.eq.s32.totalorder %s2002_s22, 0  ;;  %p2030_p10 = pnand %p1454_p7, %p166_p8 }
   0xf   : > { %s1943_s6 = smov [#allocation2]   ;;  %s1944_s9 = smov [#allocation5]  }
  0x10   : > { %s178_s7 = sshll.u32 %s1943_s6, 4  ;;  %p1765_p11 = pneg %p2030_p10  ;;  %s179_s7 = int_to_ptr.vmem [resolvable:$true] %s178_s7 }
  0x11   : > { %s191_s10 = sshll.u32 %s1944_s9, 4  ;;  %s1832_s11 = scalar_lea.vmem %s179_s7, 1024  ;;  %s192_s10 = int_to_ptr.vmem [resolvable:$true] %s191_s10 }
  0x12   : > { %p2038_p12 = pnand %p2444_p9, %p1765_p11  ;;  %p1833_p0 = scmp.ne.s32.totalorder %s179_s7, %s1832_s11 }
  0x13   : > { %p1840_p3 = scmp.lt.s32.totalorder %s179_s7, %s179_s7  ;;  %p1841_p4 = scmp.lt.s32.totalorder %s1832_s11, %s1832_s11 }
  0x14   : > { %p1823_p13 = pneg %p2038_p12 }
  0x15   : > { %p1842_p7 = por %p1841_p4, %p1840_p3 }
  0x16   : > { %p1835_p1 = pnand %p1833_p0, %p1823_p13 }
  0x18   : > { %p1836_p2 = pneg %p1835_p1 }
  0x1a   : > { %p1843_p8 = pnand %p1842_p7, %p1836_p2 }
  0x1c   : > { %1846 = shalt.err (!%p1843_p8)
}
  0x1d   : > { %s1945_s12 = smov 128   ;;  %s1946_s13 = smov 8  }
  0x1e   : > { %1768 = dma.hbm_to_vmem [thread:$0]  (!%p2038_p12), %s2440_s2, 1024, %s179_s7, [#allocation3], %s1945_s12, %s1945_s12, %s1946_s13  }
  0x1f   : > { %s1858_s16 = scalar_lea.vmem %s192_s10, 640  ;;  %p1866_p9 = scmp.lt.s32.totalorder %s192_s10, %s192_s10 }
  0x20   : > { %p1859_p11 = scmp.ne.s32.totalorder %s192_s10, %s1858_s16  ;;  %p1867_p6 = scmp.lt.s32.totalorder %s1858_s16, %s1858_s16 }
  0x22   : > { %p1861_p0 = pnand %p1859_p11, %p1823_p13  ;;  %p1868_p3 = por %p1867_p6, %p1866_p9 }
  0x24   : > { %p1862_p1 = pneg %p1861_p0 }
  0x26   : > { %p1869_p2 = pnand %p1868_p3, %p1862_p1 }
  0x28   : > { %1872 = shalt.err (!%p1869_p2)
}
  0x29   : > { %1771 = dma.hbm_to_vmem [thread:$0]  (!%p2038_p12), %s2441_s3, 640, %s192_s10, [#allocation6], %s1945_s12, %s1945_s12, %s1946_s13  }
  0x2a   : > { %224 = sbr.rel (%p2030_p10) target bundleno = 439 (0x1b7), region = 40  ;;  %p2449_p4 = scmp.eq.s32.totalorder (!%p2030_p10), %s2002_s22, 0 }
  0x2f   : > { %1916 = dma.done.wait (%p2449_p4), [#allocation3], 1024   ;;  %p2450_p13 = pmov %p2449_p4 }
  0x30   : > { %p2451_p7 = pmov %p2449_p4 }
  0x31   : > { %1918 = vsyncadd (%p2450_p13), [#allocation3], 4294966272 }
  0x32   : > { %1920 = dma.done.wait (%p2451_p7), [#allocation6], 640   ;;  %p2452_p6 = pmov %p2449_p4 }
  0x33   : > { %p259_p9 = scmp.lt.s32.totalorder %s2002_s22, 1  ;;  %v1947_v0 = vmov 0   ;;  %v1948_v1 = vmov 0.0   ;;  %vm1949_vm0 = vmmov 0   ;;  %vm290_vm1 = vcmask 269312   ;;  %v288_v7 = vld [vmem:[#allocation5 + $0x18] sm:$0xff] }
  0x34   : > { %1922 = vsyncadd (%p2452_p6), [#allocation6], 4294966656  ;;  %1820 = vset.pattern.permute.xlu0 %v1947_v0  ;;  %1563 = vmatprep.subr.mxu0 %v1948_v1  ;;  %vm294_vm2 = vcmask 1040384   ;;  %v289_v4 = vld [vmem:[#allocation5 + $0x20] sm:$0x1]  ;;  %v287_v8 = vld [vmem:[#allocation5 + $0x10] sm:$0xff] }
  0x35   : > { %s260_s25 = scalar_select %p259_p9, %s2002_s22, 1  ;;  %1576 = vmatprep.subr.mxu1 %v1948_v1  ;;  %1573 = vmatprep.mubr.msk.f32.mxu0 %vm1949_vm0, %v1948_v1  ;;  %v296_v6 = vsel %vm294_vm2, %v289_v4, 0  ;;  %v286_v9 = vld [vmem:[#allocation5 + $0x8] sm:$0xff]  ;;  %v2088_v12 = vand.u32 4294901760, %v288_v7  ;;  %v2090_v13 = vand.u32 4294901760, %v287_v8  ;;  %v285_v14 = vld [vmem:[#allocation5] sm:$0xff] }
  0x36   : > { %1586 = vmatprep.mubr.msk.f32.mxu1 %vm1949_vm0, %v1948_v1  ;;  %v2086_v11 = vand.u32 4294901760, %v296_v6  ;;  %v2092_v15 = vand.u32 4294901760, %v286_v9  ;;  %v2094_v16 = vand.u32 4294901760, %v285_v14  ;;  %v283_v41 = vld [vmem:[#allocation2 + $0x38] sm:$0xff]  ;;  %v282_v42 = vld [vmem:[#allocation2 + $0x30] sm:$0xff]  ;;  %v281_v44 = vld [vmem:[#allocation2 + $0x28] sm:$0xff] }
  0x37   : > { %s1462_s26 = sshll.u32 %s260_s25, 3  ;;  %v2104_v19 = vsub.f32 %v288_v7, %v2088_v12  ;;  %v2107_v20 = vsub.f32 %v287_v8, %v2090_v13  ;;  %v2164_v43 = vand.u32 4294901760, %v283_v41  ;;  %v2171_v45 = vand.u32 4294901760, %v282_v42  ;;  %v280_v46 = vld [vmem:[#allocation2 + $0x20] sm:$0xff]  ;;  %v279_v49 = vld [vmem:[#allocation2 + $0x18] sm:$0xff]  ;;  %v278_v52 = vld [vmem:[#allocation2 + $0x10] sm:$0xff] }
  0x38   : > { %s262_s7 = scalar_lea.vmem %s2438_s0, %s1462_s26  ;;  %s266_s10 = scalar_lea.vmem %s2439_s1, %s1462_s26  ;;  %1564 = vmatpush3.msra.mxu0 %v2086_v11  ;;  %v2101_v18 = vsub.f32 %v296_v6, %v2086_v11  ;;  %v2111_v21 = vsub.f32 %v286_v9, %v2092_v15  ;;  %v2114_v22 = vsub.f32 %v285_v14, %v2094_v16  ;;  %v2180_v48 = vand.u32 4294901760, %v281_v44  ;;  %v277_v56 = vld [vmem:[#allocation2 + $0x8] sm:$0xff]  ;;  %v276_v60 = vld [vmem:[#allocation2] sm:$0xff] }
  0x39   : > { %v267_v2 = vld [vmem:[%s262_s7] sm:$0xff]  ;;  %1565 = vmatprep.subr.mxu0 %v1948_v1  ;;  %v410_v24 = vand.u32 4294901760, %v2104_v19  ;;  %v417_v25 = vand.u32 4294901760, %v2107_v20  ;;  %v2178_v47 = vsub.f32 %v283_v41, %v2164_v43  ;;  %v2189_v50 = vsub.f32 %v282_v42, %v2171_v45  ;;  %s256_s11 = sand.u32 1, %s1933_s19   ;;  %s1470_s15 = sshll.u32 %s2002_s22, 7 }
  0x3a   : > { %v284_v3 = vld [vmem:[%s266_s10] sm:$0xff]  ;;  %271 = vperm.xlu0 %1820, %v267_v2   ;;  %1566 = vmatpush3.msra.mxu0 %v2088_v12  ;;  %v403_v23 = vand.u32 4294901760, %v2101_v18  ;;  %v424_v27 = vand.u32 4294901760, %v2111_v21  ;;  %v431_v28 = vand.u32 4294901760, %v2114_v22  ;;  %v2191_v51 = vand.u32 4294901760, %v280_v46  ;;  %s1461_s12 = sshll.u32 %s256_s11, 3  ;;  %s1358_s26 = scalar_lea.hbm %s2443_s5, %s1470_s15 }
  0x3b   : > { %v292_v5 = vsel %vm290_vm1, %v284_v3, 0  ;;  %1567 = vmatprep.subr.mxu0 %v1948_v1  ;;  %v411_v30 = vsub.f32 %v2104_v19, %v410_v24  ;;  %v418_v31 = vsub.f32 %v2107_v20, %v417_v25  ;;  %v902_v53 = vand.u32 4294901760, %v2178_v47  ;;  %s258_s16 = scalar_lea.vmem [#allocation7], %s1461_s12  ;;  %s1347_s30 = scalar_lea.sflag [#allocation4], %s256_s11 }
  0x3c   : > { %v2084_v10 = vand.u32 4294901760, %v292_v5  ;;  %v404_v29 = vsub.f32 %v2101_v18, %v403_v23  ;;  %1568 = vmatpush3.msra.mxu0 %v2090_v13  ;;  %v425_v35 = vsub.f32 %v2111_v21, %v424_v27  ;;  %v432_v38 = vsub.f32 %v2114_v22, %v431_v28  ;;  %s1360_s17 = sshll.u32 %s258_s16, 4  ;;  %s1950_s7 = smov [#allocation7]   ;;  %s1361_s17 = int_to_ptr.vmem [resolvable:$true] %s1360_s17 }
  0x3d   : > { %1569 = vmatprep.subr.mxu0 %v1948_v1  ;;  %v412_v34 = vand.u32 4294901760, %v411_v30  ;;  %v419_v37 = vand.u32 4294901760, %v418_v31  ;;  %v2200_v54 = vsub.f32 %v281_v44, %v2180_v48  ;;  %v2202_v55 = vand.u32 4294901760, %v279_v49  ;;  %s1873_s6 = scalar_lea.vmem %s1361_s17, 128  ;;  %s1877_s8 = sshll.u32 %s1950_s7, 4  ;;  %s1878_s8 = int_to_ptr.vmem [resolvable:$false] %s1877_s8 }
  0x3e   : > { %v2097_v17 = vsub.f32 %v292_v5, %v2084_v10  ;;  %v405_v33 = vand.u32 4294901760, %v404_v29  ;;  %1570 = vmatpush3.msra.mxu0 %v2092_v15  ;;  %v426_v39 = vand.u32 4294901760, %v425_v35  ;;  %v433_v40 = vand.u32 4294901760, %v432_v38  ;;  %p1874_p10 = scmp.ne.s32.totalorder %s1361_s17, %s1873_s6  ;;  %s1879_s22 = scalar_lea.vmem %s1878_s8, 256 }
  0x3f   : > { %1571 = vmatprep.subr.mxu0 %v1948_v1  ;;  %v909_v57 = vand.u32 4294901760, %v2189_v50  ;;  %v2211_v58 = vsub.f32 %v280_v46, %v2191_v51  ;;  %v2213_v59 = vand.u32 4294901760, %v278_v52  ;;  %v903_v61 = vsub.f32 %v2178_v47, %v902_v53  ;;  %p1880_p11 = scmp.lt.s32.totalorder %s1361_s17, %s1878_s8  ;;  %p1881_p0 = scmp.lt.s32.totalorder %s1879_s22, %s1873_s6 }
  0x40   : > { %v370_v26 = vand.u32 4294901760, %v2097_v17  ;;  %1577 = vmatpush3.msra.mxu1 %v405_v33  ;;  %1572 = vmatpush3.msra.mxu0 %v2094_v16  ;;  %v916_v62 = vand.u32 4294901760, %v2200_v54  ;;  %v2225_v63 = vsub.f32 %v279_v49, %v2202_v55  ;;  %v2227_v0 = vand.u32 4294901760, %v277_v56  ;;  %p1875_p12 = pnand %p1874_p10, %p2019_p5 }
  0x41   : > { %1578 = vmatprep.subr.mxu1 %v1948_v1  ;;  %1589 = vmatprep.subr.mxu0 %v1948_v1  ;;  %v910_v2 = vsub.f32 %v2189_v50, %v909_v57  ;;  %v923_v3 = vand.u32 4294901760, %v2211_v58  ;;  %v2239_v4 = vsub.f32 %v278_v52, %v2213_v59  ;;  %v2241_v5 = vand.u32 4294901760, %v276_v60  ;;  %p1882_p1 = por %p1881_p0, %p1880_p11 }
  0x42   : > { %v371_v32 = vsub.f32 %v2097_v17, %v370_v26  ;;  %1579 = vmatpush3.msra.mxu1 %v412_v34  ;;  %v904_v6 = vand.u32 4294901760, %v903_v61  ;;  %v917_v7 = vsub.f32 %v2200_v54, %v916_v62  ;;  %v930_v8 = vand.u32 4294901760, %v2225_v63  ;;  %p1876_p8 = pneg %p1875_p12 }
  0x43   : > { %1580 = vmatprep.subr.mxu1 %v1948_v1  ;;  %v2254_v9 = vsub.f32 %v277_v56, %v2227_v0  ;;  %v2266_v14 = vsub.f32 %v276_v60, %v2241_v5  ;;  %vm796_vm3 = vcmask 523264  }
  0x44   : > { %v372_v36 = vand.u32 4294901760, %v371_v32  ;;  %1581 = vmatpush3.msra.mxu1 %v419_v37  ;;  %p1883_p3 = pnand %p1882_p1, %p1876_p8 }
  0x45   : > { %1582 = vmatprep.subr.mxu1 %v1948_v1 }
  0x46   : > { %1574 = vmatmul.mubr.f32.vlgmr.msra.gmra.mxu0 %v372_v36  ;;  %1583 = vmatpush3.msra.mxu1 %v426_v39 }
  0x47   : > { %1590 = vmatpush3.msra.mxu0 %v2101_v18  ;;  %1584 = vmatprep.subr.mxu1 %v1948_v1 }
  0x48   : > { %1591 = vmatprep.subr.mxu0 %v1948_v1  ;;  %1585 = vmatpush3.msra.mxu1 %v433_v40 }
  0x49   : > { %1592 = vmatpush3.msra.mxu0 %v2104_v19  ;;  %1602 = vmatprep.subr.mxu1 %v1948_v1  ;;  %v951_v19 = vand.u32 4294901760, %v2266_v14 }
  0x4a   : > { %1593 = vmatprep.subr.mxu0 %v1948_v1  ;;  %1587 = vmatmul.mubr.f32.vlgmr.msra.gmra.mxu1 %v2084_v10 }
  0x4b   : > { %1594 = vmatpush3.msra.mxu0 %v2107_v20  ;;  %1603 = vmatpush3.msra.mxu1 %v2086_v11 }
  0x4c   : > { %1595 = vmatprep.subr.mxu0 %v1948_v1  ;;  %1604 = vmatprep.subr.mxu1 %v1948_v1 }
  0x4d   : > { %1596 = vmatpush3.msra.mxu0 %v2111_v21  ;;  %1605 = vmatpush3.msra.mxu1 %v2088_v12 }
  0x4e   : > { %1597 = vmatprep.subr.mxu0 %v1948_v1  ;;  %1606 = vmatprep.subr.mxu1 %v1948_v1 }
  0x4f   : > { %1598 = vmatpush3.msra.mxu0 %v2114_v22  ;;  %1599 = vmatprep.mubr.msk.f32.mxu0 %vm1949_vm0, %v1948_v1 }
  0x50   : > { %1607 = vmatpush3.msra.mxu1 %v2090_v13  ;;  %1615 = vmatprep.subr.mxu0 %v1948_v1 }
  0x51   : > { %1608 = vmatprep.subr.mxu1 %v1948_v1  ;;  %1600 = vmatmul.mubr.f32.vlgmr.msra.gmra.mxu0 %v2097_v17  ;;  %v944_v17 = vand.u32 4294901760, %v2254_v9 }
  0x52   : > { %1609 = vmatpush3.msra.mxu1 %v2092_v15  ;;  %1616 = vmatpush3.msra.mxu0 %v403_v23  ;;  %v952_v23 = vsub.f32 %v2266_v14, %v951_v19 }
  0x53   : > { %1610 = vmatprep.subr.mxu1 %v1948_v1  ;;  %1612 = vmatprep.mubr.msk.f32.mxu1 %vm1949_vm0, %v1948_v1  ;;  %v945_v21 = vsub.f32 %v2254_v9, %v944_v17 }
  0x54   : > { %1611 = vmatpush3.msra.mxu1 %v2094_v16  ;;  %1617 = vmatprep.subr.mxu0 %v1948_v1 }
  0x55   : > { %1628 = vmatprep.subr.mxu1 %v1948_v1  ;;  %1613 = vmatmul.mubr.f32.vlgmr.msra.gmra.mxu1 %v370_v26  ;;  %v268_v26 = vlaneseq }
  0x56   : > { %1618 = vmatpush3.msra.mxu0 %v410_v24  ;;  %1629 = vmatpush3.msra.mxu1 %v2086_v11  ;;  %v911_v11 = vand.u32 4294901760, %v910_v2  ;;  %v946_v24 = vand.u32 4294901760, %v945_v21 }
  0x57   : > { %1619 = vmatprep.subr.mxu0 %v1948_v1  ;;  %1630 = vmatprep.subr.mxu1 %v1948_v1 }
  0x58   : > { %1620 = vmatpush3.msra.mxu0 %v417_v25  ;;  %1631 = vmatpush3.msra.mxu1 %v2088_v12  ;;  %v924_v12 = vsub.f32 %v2211_v58, %v923_v3  ;;  %v953_v25 = vand.u32 4294901760, %v952_v23 }
  0x59   : > { %1621 = vmatprep.subr.mxu0 %v1948_v1  ;;  %1632 = vmatprep.subr.mxu1 %v1948_v1 }
  0x5a   : > { %1622 = vmatpush3.msra.mxu0 %v424_v27  ;;  %1633 = vmatpush3.msra.mxu1 %v2090_v13  ;;  %v937_v13 = vand.u32 4294901760, %v2239_v4  ;;  %v925_v18 = vand.u32 4294901760, %v924_v12  ;;  %v269_v27 = vand.u32 127, %v268_v26 }
  0x5b   : > { %1623 = vmatprep.subr.mxu0 %v1948_v1  ;;  %1634 = vmatprep.subr.mxu1 %v1948_v1 }
  0x5c   : > { %1624 = vmatpush3.msra.mxu0 %v431_v28  ;;  %1625 = vmatprep.mubr.msk.f32.mxu0 %vm1949_vm0, %v1948_v1 }
  0x5d   : > { %1635 = vmatpush3.msra.mxu1 %v2092_v15  ;;  %1626 = vmatmul.mubr.f32.vlgmr.msra.gmra.mxu0 %v2084_v10  ;;  %v918_v15 = vand.u32 4294901760, %v917_v7 }
  0x5e   : > { %1636 = vmatprep.subr.mxu1 %v1948_v1  ;;  %1638 = vmatprep.mubr.msk.f32.mxu1 %vm1949_vm0, %v1948_v1 }
  0x5f   : > { %1637 = vmatpush3.msra.mxu1 %v2094_v16  ;;  %1641 = vmatprep.subr.mxu0 %v1948_v1  ;;  %v931_v16 = vsub.f32 %v2225_v63, %v930_v8 }
  0x60   : > { %1639 = vmatmul.mubr.f32.vlgmr.msra.gmra.mxu1 %v2084_v10  ;;  %1660 = vmatprep.subr.mxu1 %v1948_v1  ;;  %v938_v10 = vsub.f32 %v2239_v4, %v937_v13 }
  0x61   : > { %1661 = vmatpush3.msra.mxu1 %v904_v6  ;;  %1642 = vmatpush3.msra.mxu0 %v2164_v43  ;;  %v932_v20 = vand.u32 4294901760, %v931_v16 }
  0x62   : > { %1662 = vmatprep.subr.mxu1 %v1948_v1  ;;  %1643 = vmatprep.subr.mxu0 %v1948_v1  ;;  %v939_v22 = vand.u32 4294901760, %v938_v10 }
  0x63   : > { %1663 = vmatpush3.msra.mxu1 %v911_v11  ;;  %1644 = vmatpush3.msra.mxu0 %v2171_v45 }
  0x64   : > { %1664 = vmatprep.subr.mxu1 %v1948_v1  ;;  %1645 = vmatprep.subr.mxu0 %v1948_v1 }
  0x65   : > { %1665 = vmatpush3.msra.mxu1 %v918_v15  ;;  %1646 = vmatpush3.msra.mxu0 %v2180_v48 }
  0x66   : > { %1666 = vmatprep.subr.mxu1 %v1948_v1  ;;  %1647 = vmatprep.subr.mxu0 %v1948_v1 }
  0x67   : > { %1667 = vmatpush3.msra.mxu1 %v925_v18  ;;  %1648 = vmatpush3.msra.mxu0 %v2191_v51 }
  0x68   : > { %1668 = vmatprep.subr.mxu1 %v1948_v1  ;;  %1676 = vmatprep.mubr.msk.f32.mxu1 %vm1949_vm0, %v1948_v1 }
  0x69   : > { %1669 = vmatpush3.msra.mxu1 %v932_v20  ;;  %1649 = vmatprep.subr.mxu0 %v1948_v1 }
  0x6a   : > { %1670 = vmatprep.subr.mxu1 %v1948_v1  ;;  %1650 = vmatpush3.msra.mxu0 %v2202_v55 }
  0x6b   : > { %1671 = vmatpush3.msra.mxu1 %v939_v22  ;;  %1651 = vmatprep.subr.mxu0 %v1948_v1 }
  0x6c   : > { %1672 = vmatprep.subr.mxu1 %v1948_v1  ;;  %1652 = vmatpush3.msra.mxu0 %v2213_v59 }
  0x6d   : > { %1673 = vmatpush3.msra.mxu1 %v946_v24  ;;  %1653 = vmatprep.subr.mxu0 %v1948_v1 }
  0x6e   : > { %1674 = vmatprep.subr.mxu1 %v1948_v1  ;;  %1654 = vmatpush3.msra.mxu0 %v2227_v0 }
  0x6f   : > { %1675 = vmatpush3.msra.mxu1 %v953_v25  ;;  %1655 = vmatprep.subr.mxu0 %v1948_v1 }
  0x70   : > { %1698 = vmatprep.subr.mxu1 %v1948_v1  ;;  %1656 = vmatpush3.msra.mxu0 %v2241_v5 }
  0x71   : > { %1657 = vmatprep.mubr.msk.f32.mxu0 %vm1949_vm0, %v1948_v1  ;;  %1679 = vmatprep.subr.mxu0 %v1948_v1 }
  0xb5   : > { %v272_v28 = vpop.permute.xlu0 %271 }
  0xb6   : > { %vm273_vm4 = vcmp.eq.s32.totalorder %v272_v28, %v269_v27 }
  0xb7   : > { %v2313_v29 = vsel %vm273_vm4, 1.0, %v1948_v1 }
  0xb8   : > { %v798_v30 = vsel %vm796_vm3, %v2313_v29, 0  ;;  %1677 = vmatmul.mubr.msk.f32.vlgmr.msra.gmra.mxu1 %vm796_vm3, %v2313_v29 }
  0xb9   : > { %v874_v31 = vsub.f32 %v798_v30, %v798_v30  ;;  %1699 = vmatpush3.msra.mxu1 %v2164_v43  ;;  %1714 = vmatprep.mubr.msk.f32.mxu1 %vm1949_vm0, %v1948_v1 }
  0xba   : > { %1700 = vmatprep.subr.mxu1 %v1948_v1 }
  0xbb   : > { %1701 = vmatpush3.msra.mxu1 %v2171_v45  ;;  %v875_v32 = vand.u32 4294901760, %v874_v31 }
  0xbc   : > { %1702 = vmatprep.subr.mxu1 %v1948_v1 }
  0xbd   : > { %1703 = vmatpush3.msra.mxu1 %v2180_v48  ;;  %v876_v33 = vsub.f32 %v874_v31, %v875_v32 }
  0xbe   : > { %1704 = vmatprep.subr.mxu1 %v1948_v1 }
  0xbf   : > { %1705 = vmatpush3.msra.mxu1 %v2191_v51  ;;  %v877_v34 = vand.u32 4294901760, %v876_v33 }
  0xc0   : > { %1706 = vmatprep.subr.mxu1 %v1948_v1 }
  0xc1   : > { %1707 = vmatpush3.msra.mxu1 %v2202_v55  ;;  %1658 = vmatmul.mubr.f32.vlgmr.msra.gmra.mxu0 %v877_v34 }
  0xc2   : > { %1680 = vmatpush3.msra.mxu0 %v2178_v47  ;;  %1708 = vmatprep.subr.mxu1 %v1948_v1 }
  0xc3   : > { %1681 = vmatprep.subr.mxu0 %v1948_v1  ;;  %1709 = vmatpush3.msra.mxu1 %v2213_v59 }
  0xc4   : > { %1682 = vmatpush3.msra.mxu0 %v2189_v50  ;;  %1710 = vmatprep.subr.mxu1 %v1948_v1 }
  0xc5   : > { %1683 = vmatprep.subr.mxu0 %v1948_v1  ;;  %1711 = vmatpush3.msra.mxu1 %v2227_v0 }
  0xc6   : > { %1684 = vmatpush3.msra.mxu0 %v2200_v54  ;;  %1712 = vmatprep.subr.mxu1 %v1948_v1 }
  0xc7   : > { %1685 = vmatprep.subr.mxu0 %v1948_v1  ;;  %1713 = vmatpush3.msra.mxu1 %v2241_v5 }
  0xc8   : > { %1686 = vmatpush3.msra.mxu0 %v2211_v58  ;;  %1715 = vmatmul.mubr.f32.vlgmr.msra.gmra.mxu1 %v875_v32 }
  0xc9   : > { %1736 = vmatprep.subr.mxu1 %v1948_v1  ;;  %1687 = vmatprep.subr.mxu0 %v1948_v1 }
  0xca   : > { %1737 = vmatpush3.msra.mxu1 %v2164_v43  ;;  %1688 = vmatpush3.msra.mxu0 %v2225_v63 }
  0xcb   : > { %1738 = vmatprep.subr.mxu1 %v1948_v1  ;;  %1689 = vmatprep.subr.mxu0 %v1948_v1 }
  0xcc   : > { %1739 = vmatpush3.msra.mxu1 %v2171_v45  ;;  %1690 = vmatpush3.msra.mxu0 %v2239_v4  ;;  %v1468_v4 = vld [vmem:[%s2442_s4] ss:$0 sm:$0xff] }
  0xcd   : > { %1740 = vmatprep.subr.mxu1 %v1948_v1  ;;  %1691 = vmatprep.subr.mxu0 %v1948_v1 }
  0xce   : > { %1741 = vmatpush3.msra.mxu1 %v2180_v48  ;;  %1692 = vmatpush3.msra.mxu0 %v2254_v9 }
  0xcf   : > { %1742 = vmatprep.subr.mxu1 %v1948_v1  ;;  %1693 = vmatprep.subr.mxu0 %v1948_v1 }
  0xd0   : > { %1743 = vmatpush3.msra.mxu1 %v2191_v51  ;;  %1694 = vmatpush3.msra.mxu0 %v2266_v14 }
  0xd1   : > { %1695 = vmatprep.mubr.msk.f32.mxu0 %vm1949_vm0, %v1948_v1  ;;  %1744 = vmatprep.subr.mxu1 %v1948_v1 }
  0xd2   : > { %1696 = vmatmul.mubr.f32.vlgmr.msra.gmra.mxu0 %v874_v31  ;;  %1717 = vmatprep.subr.mxu0 %v1948_v1 }
  0xd3   : > { %1745 = vmatpush3.msra.mxu1 %v2202_v55  ;;  %1718 = vmatpush3.msra.mxu0 %v902_v53 }
  0xd4   : > { %1746 = vmatprep.subr.mxu1 %v1948_v1  ;;  %1719 = vmatprep.subr.mxu0 %v1948_v1 }
  0xd5   : > { %1747 = vmatpush3.msra.mxu1 %v2213_v59  ;;  %1720 = vmatpush3.msra.mxu0 %v909_v57 }
  0xd6   : > { %1748 = vmatprep.subr.mxu1 %v1948_v1  ;;  %1721 = vmatprep.subr.mxu0 %v1948_v1 }
  0xd7   : > { %1749 = vmatpush3.msra.mxu1 %v2227_v0  ;;  %1722 = vmatpush3.msra.mxu0 %v916_v62 }
  0xd8   : > { %1750 = vmatprep.subr.mxu1 %v1948_v1  ;;  %1723 = vmatprep.subr.mxu0 %v1948_v1 }
  0xd9   : > { %1751 = vmatpush3.msra.mxu1 %v2241_v5  ;;  %1752 = vmatprep.mubr.msk.f32.mxu1 %vm1949_vm0, %v1948_v1 }
  0xda   : > { %1724 = vmatpush3.msra.mxu0 %v923_v3  ;;  %1753 = vmatmul.mubr.msk.f32.vlgmr.msra.gmra.mxu1 %vm796_vm3, %v2313_v29 }
  0xdb   : > { %1725 = vmatprep.subr.mxu0 %v1948_v1  ;;  %1733 = vmatprep.mubr.msk.f32.mxu0 %vm1949_vm0, %v1948_v1 }
  0xdc   : > { %1726 = vmatpush3.msra.mxu0 %v930_v8 }
  0xdd   : > { %1727 = vmatprep.subr.mxu0 %v1948_v1 }
  0xde   : > { %1728 = vmatpush3.msra.mxu0 %v937_v13 }
  0xdf   : > { %1729 = vmatprep.subr.mxu0 %v1948_v1 }
  0xe0   : > { %1730 = vmatpush3.msra.mxu0 %v944_v17 }
  0xe1   : > { %1731 = vmatprep.subr.mxu0 %v1948_v1 }
  0xe2   : > { %1732 = vmatpush3.msra.mxu0 %v951_v19 }
  0xe3   : > { %1734 = vmatmul.mubr.msk.f32.vlgmr.msra.gmra.mxu0 %vm796_vm3, %v2313_v29 }
 0x106   : > { %v374_v35 = vpop.f32.mrf.mxu0 }
 0x108   : > { %v1575_v36 = vpop.f32.mrf.mxu0 }
 0x10a   : > { %v470_v37 = vpop.f32.mrf.mxu1 }
 0x10b   : > { %v471_v38 = vadd.f32 %v470_v37, %v374_v35 }
 0x10c   : > { %v1588_v39 = vpop.f32.mrf.mxu1 }
 0x111   : > { %v552_v40 = vpop.f32.mrf.mxu0 }
 0x112   : > { %v553_v41 = vadd.f32 %v552_v40, %v471_v38 }
 0x113   : > { %v1601_v42 = vpop.f32.mrf.mxu0 }
 0x115   : > { %v630_v43 = vpop.f32.mrf.mxu1 }
 0x116   : > { %v631_v44 = vadd.f32 %v630_v43, %v553_v41 }
 0x117   : > { %v1614_v45 = vpop.f32.mrf.mxu1 }
 0x11d   : > { %v716_v46 = vpop.f32.mrf.mxu0 }
 0x11e   : > { %v717_v47 = vadd.f32 %v716_v46, %v631_v44 }
 0x11f   : > { %v1627_v1 = vpop.f32.mrf.mxu0 }
 0x120   : > { %v792_v48 = vpop.f32.mrf.mxu1 }
 0x121   : > { %v793_v49 = vadd.f32 %v792_v48, %v717_v47 }
 0x122   : > { %v1640_v50 = vpop.f32.mrf.mxu1 }
 0x178   : > { %v990_v51 = vpop.f32.mrf.mxu1 }
 0x17a   : > { %v1678_v52 = vpop.f32.mrf.mxu1 }
 0x181   : > { %v879_v53 = vpop.f32.mrf.mxu0 }
 0x182   : > { %v880_v59 = vadd.f32 %v879_v53, %v793_v49 }
 0x183   : > { %v1659_v54 = vpop.f32.mrf.mxu0 }
 0x184   : > { %v991_v61 = vadd.f32 %v990_v51, %v880_v59 }
 0x188   : > { %v1159_v55 = vpop.f32.mrf.mxu1 }
 0x18a   : > { %v1716_v56 = vpop.f32.mrf.mxu1 }
 0x192   : > { %v1078_v57 = vpop.f32.mrf.mxu0 }
 0x193   : > { %v1079_v63 = vadd.f32 %v1078_v57, %v991_v61 }
 0x194   : > { %v1697_v58 = vpop.f32.mrf.mxu0 }
 0x195   : > { %v1160_v0 = vadd.f32 %v1159_v55, %v1079_v63 }
 0x19a   : > { %v1333_v60 = vpop.f32.mrf.mxu1 }
 0x19c   : > { %v1754_v62 = vpop.f32.mrf.mxu1 }
 0x1a3   : > { %v1254_v2 = vpop.f32.mrf.mxu0 }
 0x1a4   : > { %v1255_v3 = vadd.f32 %v1254_v2, %v1160_v0 }
 0x1a5   : > { %v1735_v5 = vpop.f32.mrf.mxu0 }
 0x1a6   : > { %v1334_v6 = vadd.f32 %v1333_v60, %v1255_v3 }
 0x1a8   : > { %v1344_v7 = vadd.f32 %v1468_v4, %v1334_v6 }
 0x1aa   : > { %1345 = vst [vmem:[%s258_s16] sm:$0xff] %v1344_v7 }
 0x1ab   : > { %1886 = shalt.err (!%p1883_p3)
}
 0x1ac   : > { %s1887_s9 = scalar_lea.hbm %s1358_s26, 128  ;;  %s1891_s12 = scalar_lea.hbm %s2443_s5, 256 }
 0x1ad   : > { %p1888_p2 = scmp.ne.s32.totalorder %s1358_s26, %s1887_s9  ;;  %p1892_p7 = scmp.lt.s32.totalorder %s1358_s26, %s2443_s5 }
 0x1ae   : > { %p1893_p6 = scmp.lt.s32.totalorder %s1891_s12, %s1887_s9 }
 0x1af   : > { %p1889_p4 = pnand %p1888_p2, %p2019_p5 }
 0x1b0   : > { %p1894_p9 = por %p1893_p6, %p1892_p7 }
 0x1b1   : > { %p1890_p13 = pneg %p1889_p4 }
 0x1b3   : > { %p1895_p10 = pnand %p1894_p9, %p1890_p13 }
 0x1b5   : > { %1898 = shalt.err (!%p1895_p10)
}
 0x1b6   : > { %1763 = dma.vmem_to_hbm [thread:$0]  (%p2019_p5), %s1361_s17, 128, %s1358_s26, %s1347_s30  }
 0x1b7 PF: > { %p1780_p12 = scmp.ge.s32.totalorder %s1941_s21, 2  ;;  %s1372_s15 = sand.u32 1, %s1929_s18  }
 0x1b8   : > { %p2453_p8 = scmp.ne.s32.totalorder %s2446_s29, 0  ;;  %s1373_s16 = scalar_lea.sflag [#allocation4], %s1372_s15 }
 0x1ba   : > { %p1773_p11 = pnand %p1780_p12, %p2453_p8 }
 0x1bc   : > { %p1774_p0 = pneg %p1773_p11 }
 0x1be   : > { %1924 = dma.done.wait (%p1774_p0), %s1373_s16, 128  }
 0x1bf   : > { %1926 = vsyncadd (%p1774_p0), %s1373_s16, 4294967168  ;;  %p17_p1 = scmp.ge.s32.totalorder %s2006_s24, 4   ;;  %s2454_s18 = smov %s1933_s19 }
 0x1c0   : > { %s2455_s19 = smov %s1937_s20  ;;  %s2456_s20 = smov %s2017_s27 }
 0x1c1   : > { %s2457_s21 = smov %s2006_s24  ;;  %19 = sbr.rel (!%p17_p1) target bundleno = 5 (0x5), region = 87 }
 0x1c6   :  { %1378 = vsyncpa [#allocation3], 1 }
 0x1c7   :  { %1380 = vsyncpa [#allocation3 + $0x1], 1 }
 0x1c8   :  { %1381 = vsyncpa [#allocation6], 1 }
 0x1c9   :  { %1382 = vsyncpa [#allocation4], 1 }
 0x1ca   :  { %1384 = vsyncpa [#allocation4 + $0x1], 1 }

</bundles_post_ra>
